<compile_context>
chip_gen: v7x
topology: tpu7x:2x2x1
jax: 0.10.0
libtpu: 0.0.40
codegen_flags: <defaults>
</compile_context>

<pallas_src>
import numpy as np
import jax
import jax.numpy as jnp
from jax.experimental import pallas as pl
from jax.experimental.pallas import tpu as pltpu

# ----------------------------------------------------------------------------
# Synthetic "config" (the original pulls these from an external config dict).
# ----------------------------------------------------------------------------
config = {
    "dense_dim": 8,
    "label_num": 2,
    "loss_function": "bce",   # -> last layer size [1]
    "sparses_dim": 16,
    "sparses_field": 4,
    "ln": [64, 32],
}

dense_dim = config["dense_dim"]
label_num = config["label_num"]
loss_function = config["loss_function"]
last_layer_size = [label_num] if loss_function == "cse" else [1]
sparses_dim = config["sparses_dim"]
sparses_field = config["sparses_field"]


def build_layer_sizes():
    ln = config["ln"]
    ln = [sparses_dim * sparses_field + dense_dim] + ln + last_layer_size
    return ln  # e.g. [72, 64, 32, 1]


def init_params(ln):
    """Deterministic parameter init matching the PyTorch module's __init__.

    Weights are pre-transposed to (in, out) and stored as bf16 (MXU-native on
    all TPU generations); biases stay f32 and are kept 2-D for clean layout.
    """
    rng = np.random.RandomState(1234)
    params = []
    for i in range(len(ln) - 1):
        m, n = ln[i], ln[i + 1]
        std_w = np.sqrt(2.0 / (m + n))
        W = rng.normal(0.0, std_w, size=(n, m)).astype(np.float32)   # torch layout (out, in)
        std_b = np.sqrt(1.0 / n)
        b = rng.normal(0.0, std_b, size=(n,)).astype(np.float32)
        params.append((jnp.asarray(W.T, dtype=jnp.bfloat16),          # (in, out), bf16
                       jnp.asarray(b.reshape(1, n), dtype=jnp.float32)))
    return params


def prepare_params(params, piece_dims):
    """Split W0 into row-blocks matching the concatenation layout, ONCE."""
    w0, b0 = params[0]
    w0_pieces = []
    off = 0
    for d in piece_dims:
        w0_pieces.append(w0[off:off + d, :])
        off += d
    assert off == w0.shape[0], "piece dims must sum to layer-0 input dim"
    rest_params = list(params[1:])
    return tuple(w0_pieces), b0, rest_params


# ----------------------------------------------------------------------------
# Pallas kernel: fused (concat + MLP) forward on one batch tile.
#   Layer 0 consumes the input "pieces" (embeddings..., dense) directly and
#   sums partial products against the matching row-blocks of W0 -> no concat.
#   All matmuls: bf16 inputs, f32 accumulation on the MXU. ReLU on all but last.
# ----------------------------------------------------------------------------
def make_dnn_kernel(n_pieces, n_rest_layers):
    def kernel(*refs):
        # refs = (x_piece_0..x_piece_{P-1},
        #         w0_piece_0..w0_piece_{P-1}, b0,
        #         w1, b1, ..., w_{L-1}, b_{L-1},
        #         out_ref)
        out_ref = refs[-1]
        x_refs = refs[:n_pieces]
        w0_refs = refs[n_pieces:2 * n_pieces]
        b0_ref = refs[2 * n_pieces]
        rest = refs[2 * n_pieces + 1:-1]

        # --- layer 0: fused concat via split-dot (sum of partial products) ---
        h = jnp.dot(x_refs[0][...].astype(jnp.bfloat16), w0_refs[0][...],
                    preferred_element_type=jnp.float32)
        for p in range(1, n_pieces):
            h = h + jnp.dot(x_refs[p][...].astype(jnp.bfloat16), w0_refs[p][...],
                            preferred_element_type=jnp.float32)
        h = jnp.maximum(h + b0_ref[...], 0.0)

        # --- remaining layers ---
        for li in range(n_rest_layers):
            w_ref = rest[2 * li]
            b_ref = rest[2 * li + 1]
            h = jnp.dot(h.astype(jnp.bfloat16), w_ref[...],
                        preferred_element_type=jnp.float32) + b_ref[...]
            if li < n_rest_layers - 1:   # ReLU on all but the last layer
                h = jnp.maximum(h, 0.0)

        out_ref[...] = h.astype(out_ref.dtype)

    return kernel


def dnn_forward(non_id_tensors, embedding_tensors, prepared, *, tile_b=1024):
    """Mirrors DNN.forward: concat(sparse embeddings, dense) -> MLP.

    The concat is fused into the kernel; the batch is tiled over a 1-D grid.
    `prepared` is the output of prepare_params (W0 pre-split by piece).
    """
    dense_x = non_id_tensors[0]
    pieces = list(embedding_tensors) + [dense_x]      # torch concat order: (sparse..., dense)
    B = pieces[0].shape[0]
    tile_b = min(tile_b, B)
    # Ragged final tiles (B % tile_b != 0) are handled by Pallas block padding;
    # the computation is row-independent so padded rows never affect real output.
    grid = (pl.cdiv(B, tile_b),)

    w0_pieces, b0, rest_params = prepared
    piece_dims = [int(p.shape[1]) for p in pieces]
    assert piece_dims == [int(w.shape[0]) for w in w0_pieces]

    out_dim = int(rest_params[-1][0].shape[1]) if rest_params else int(b0.shape[1])

    flat_inputs = list(pieces) + list(w0_pieces) + [b0]
    in_specs = (
        # Activation pieces: batch-tiled, double-buffered by the Pallas pipeline.
        [pl.BlockSpec((tile_b, d), lambda i: (i, 0)) for d in piece_dims]
        # Weights / biases: full arrays, constant index_map -> fetched once, VMEM-resident.
        + [pl.BlockSpec(w.shape, lambda i: (0, 0)) for w in w0_pieces]
        + [pl.BlockSpec(b0.shape, lambda i: (0, 0))]
    )
    for (w, b) in rest_params:
        flat_inputs += [w, b]
        in_specs += [pl.BlockSpec(w.shape, lambda i: (0, 0)),
                     pl.BlockSpec(b.shape, lambda i: (0, 0))]

    kernel = make_dnn_kernel(len(pieces), len(rest_params))

    # Advisory cost estimate (matmul flops + HBM bytes touched once).
    layer_dims = [sum(piece_dims)] + [int(w.shape[1]) for w in [w0_pieces[0]]]
    dims = [sum(piece_dims), int(b0.shape[1])] + [int(w.shape[1]) for (w, _) in rest_params]
    flops = 2 * B * sum(dims[i] * dims[i + 1] for i in range(len(dims) - 1))
    act_bytes = B * sum(piece_dims) * 4 + B * out_dim * 4
    w_bytes = sum(int(np.prod(w.shape)) * 2 + int(np.prod(b.shape)) * 4
                  for (w, b) in ([(w0_pieces[0], b0)] + rest_params))
    cost = pl.CostEstimate(flops=flops, transcendentals=0,
                           bytes_accessed=act_bytes + w_bytes)

    out = pl.pallas_call(
        kernel,
        out_shape=jax.ShapeDtypeStruct((B, out_dim), jnp.float32),
        grid=grid,
        in_specs=in_specs,
        out_specs=pl.BlockSpec((tile_b, out_dim), lambda i: (i, 0)),
        compiler_params=pltpu.CompilerParams(
            dimension_semantics=("parallel",),   # shard batch tiles across TCs on v7x
        ),
        cost_estimate=cost,
    )(*flat_inputs)
    return out


# Pure-JAX reference matching the kernel's numerics (bf16 matmul inputs, f32 accum).
def dnn_forward_ref(non_id_tensors, embedding_tensors, params):
    dense_x = non_id_tensors[0]
    h = jnp.concatenate(list(embedding_tensors) + [dense_x], axis=1)
    for i, (w, b) in enumerate(params):
        h = jnp.dot(h.astype(jnp.bfloat16), w, preferred_element_type=jnp.float32) + b
        if i < len(params) - 1:
            h = jnp.maximum(h, 0.0)
    return h


if __name__ == "__main__":
    ln = build_layer_sizes()
    params = init_params(ln)

    batch = 256           # small, but exercises the batch grid (tile_b=128 -> 2 tiles)
    key = jax.random.PRNGKey(0)
    k_dense, *k_emb = jax.random.split(key, 1 + sparses_field)

    dense_x = jax.random.normal(k_dense, (batch, dense_dim), dtype=jnp.float32)
    embedding_tensors = [
        jax.random.normal(k, (batch, sparses_dim), dtype=jnp.float32) for k in k_emb
    ]
    non_id_tensors = [dense_x]

    piece_dims = [sparses_dim] * sparses_field + [dense_dim]
    prepared = prepare_params(params, piece_dims)   # split W0 once, outside the hot path

    out = dnn_forward(non_id_tensors, embedding_tensors, prepared, tile_b=128)
    out = jax.block_until_ready(out)

    ref = dnn_forward_ref(non_id_tensors, embedding_tensors, params)
    assert out.shape == (batch, ln[-1])
    np.testing.assert_allclose(np.asarray(out), np.asarray(ref), rtol=2e-2, atol=2e-2)

    print("KERNEL_OK")
</pallas_src>

<mosaic_0001>
module attributes {stable_mosaic.version = 11 : i64} {
  func.func @kernel(%arg0: i32, %arg1: memref<128x16xf32, #tpu.memory_space<vmem>>, %arg2: memref<128x16xf32, #tpu.memory_space<vmem>>, %arg3: memref<128x16xf32, #tpu.memory_space<vmem>>, %arg4: memref<128x16xf32, #tpu.memory_space<vmem>>, %arg5: memref<128x8xf32, #tpu.memory_space<vmem>>, %arg6: memref<16x64xbf16, #tpu.memory_space<vmem>>, %arg7: memref<16x64xbf16, #tpu.memory_space<vmem>>, %arg8: memref<16x64xbf16, #tpu.memory_space<vmem>>, %arg9: memref<16x64xbf16, #tpu.memory_space<vmem>>, %arg10: memref<8x64xbf16, #tpu.memory_space<vmem>>, %arg11: memref<1x64xf32, #tpu.memory_space<vmem>>, %arg12: memref<64x32xbf16, #tpu.memory_space<vmem>>, %arg13: memref<1x32xf32, #tpu.memory_space<vmem>>, %arg14: memref<32x1xbf16, #tpu.memory_space<vmem>>, %arg15: memref<1x1xf32, #tpu.memory_space<vmem>>, %arg16: memref<128x1xf32, #tpu.memory_space<vmem>>) attributes {dimension_semantics = [#tpu.dimension_semantics<parallel>], iteration_bounds = array<i64: 2>, scalar_prefetch = 0 : i64, scratch_operands = 0 : i64, tpu.core_type = #tpu.core_type<tc>, window_params = [{transform_indices = @transform_0, window_bounds = array<i64: 128, 16>}, {transform_indices = @transform_1, window_bounds = array<i64: 128, 16>}, {transform_indices = @transform_2, window_bounds = array<i64: 128, 16>}, {transform_indices = @transform_3, window_bounds = array<i64: 128, 16>}, {transform_indices = @transform_4, window_bounds = array<i64: 128, 8>}, {pipeline_mode = #tpu.pipeline_mode<synchronous>, transform_indices = @transform_5, window_bounds = array<i64: 16, 64>}, {pipeline_mode = #tpu.pipeline_mode<synchronous>, transform_indices = @transform_6, window_bounds = array<i64: 16, 64>}, {pipeline_mode = #tpu.pipeline_mode<synchronous>, transform_indices = @transform_7, window_bounds = array<i64: 16, 64>}, {pipeline_mode = #tpu.pipeline_mode<synchronous>, transform_indices = @transform_8, window_bounds = array<i64: 16, 64>}, {pipeline_mode = #tpu.pipeline_mode<synchronous>, transform_indices = @transform_9, window_bounds = array<i64: 8, 64>}, {pipeline_mode = #tpu.pipeline_mode<synchronous>, transform_indices = @transform_10, window_bounds = array<i64: 1, 64>}, {pipeline_mode = #tpu.pipeline_mode<synchronous>, transform_indices = @transform_11, window_bounds = array<i64: 64, 32>}, {pipeline_mode = #tpu.pipeline_mode<synchronous>, transform_indices = @transform_12, window_bounds = array<i64: 1, 32>}, {pipeline_mode = #tpu.pipeline_mode<synchronous>, transform_indices = @transform_13, window_bounds = array<i64: 32, 1>}, {pipeline_mode = #tpu.pipeline_mode<synchronous>, transform_indices = @transform_14, window_bounds = array<i64: 1, 1>}, {transform_indices = @transform_15, window_bounds = array<i64: 128, 1>}]} {
    %c0 = arith.constant 0 : index
    %c0_0 = arith.constant 0 : index
    %0 = vector.load %arg1[%c0, %c0_0] : memref<128x16xf32, #tpu.memory_space<vmem>>, vector<128x16xf32>
    %1 = arith.truncf %0 : vector<128x16xf32> to vector<128x16xbf16>
    %c0_1 = arith.constant 0 : index
    %c0_2 = arith.constant 0 : index
    %2 = vector.load %arg6[%c0_1, %c0_2] : memref<16x64xbf16, #tpu.memory_space<vmem>>, vector<16x64xbf16>
    %cst = arith.constant dense<0.000000e+00> : vector<128x64xf32>
    %3 = tpu.matmul %1, %2, %cst {dimension_numbers = #tpu.dot_dimension_numbers<[1], [0], [0], [1], [0, 0, 1, 1], [], []>} : vector<128x16xbf16>, vector<16x64xbf16>, vector<128x64xf32> -> vector<128x64xf32>
    %c0_3 = arith.constant 0 : index
    %c0_4 = arith.constant 0 : index
    %4 = vector.load %arg2[%c0_3, %c0_4] : memref<128x16xf32, #tpu.memory_space<vmem>>, vector<128x16xf32>
    %5 = arith.truncf %4 : vector<128x16xf32> to vector<128x16xbf16>
    %c0_5 = arith.constant 0 : index
    %c0_6 = arith.constant 0 : index
    %6 = vector.load %arg7[%c0_5, %c0_6] : memref<16x64xbf16, #tpu.memory_space<vmem>>, vector<16x64xbf16>
    %cst_7 = arith.constant dense<0.000000e+00> : vector<128x64xf32>
    %7 = tpu.matmul %5, %6, %cst_7 {dimension_numbers = #tpu.dot_dimension_numbers<[1], [0], [0], [1], [0, 0, 1, 1], [], []>} : vector<128x16xbf16>, vector<16x64xbf16>, vector<128x64xf32> -> vector<128x64xf32>
    %8 = arith.addf %3, %7 : vector<128x64xf32>
    %c0_8 = arith.constant 0 : index
    %c0_9 = arith.constant 0 : index
    %9 = vector.load %arg3[%c0_8, %c0_9] : memref<128x16xf32, #tpu.memory_space<vmem>>, vector<128x16xf32>
    %10 = arith.truncf %9 : vector<128x16xf32> to vector<128x16xbf16>
    %c0_10 = arith.constant 0 : index
    %c0_11 = arith.constant 0 : index
    %11 = vector.load %arg8[%c0_10, %c0_11] : memref<16x64xbf16, #tpu.memory_space<vmem>>, vector<16x64xbf16>
    %cst_12 = arith.constant dense<0.000000e+00> : vector<128x64xf32>
    %12 = tpu.matmul %10, %11, %cst_12 {dimension_numbers = #tpu.dot_dimension_numbers<[1], [0], [0], [1], [0, 0, 1, 1], [], []>} : vector<128x16xbf16>, vector<16x64xbf16>, vector<128x64xf32> -> vector<128x64xf32>
    %13 = arith.addf %8, %12 : vector<128x64xf32>
    %c0_13 = arith.constant 0 : index
    %c0_14 = arith.constant 0 : index
    %14 = vector.load %arg4[%c0_13, %c0_14] : memref<128x16xf32, #tpu.memory_space<vmem>>, vector<128x16xf32>
    %15 = arith.truncf %14 : vector<128x16xf32> to vector<128x16xbf16>
    %c0_15 = arith.constant 0 : index
    %c0_16 = arith.constant 0 : index
    %16 = vector.load %arg9[%c0_15, %c0_16] : memref<16x64xbf16, #tpu.memory_space<vmem>>, vector<16x64xbf16>
    %cst_17 = arith.constant dense<0.000000e+00> : vector<128x64xf32>
    %17 = tpu.matmul %15, %16, %cst_17 {dimension_numbers = #tpu.dot_dimension_numbers<[1], [0], [0], [1], [0, 0, 1, 1], [], []>} : vector<128x16xbf16>, vector<16x64xbf16>, vector<128x64xf32> -> vector<128x64xf32>
    %18 = arith.addf %13, %17 : vector<128x64xf32>
    %c0_18 = arith.constant 0 : index
    %c0_19 = arith.constant 0 : index
    %19 = vector.load %arg5[%c0_18, %c0_19] : memref<128x8xf32, #tpu.memory_space<vmem>>, vector<128x8xf32>
    %20 = arith.truncf %19 : vector<128x8xf32> to vector<128x8xbf16>
    %c0_20 = arith.constant 0 : index
    %c0_21 = arith.constant 0 : index
    %21 = vector.load %arg10[%c0_20, %c0_21] : memref<8x64xbf16, #tpu.memory_space<vmem>>, vector<8x64xbf16>
    %cst_22 = arith.constant dense<0.000000e+00> : vector<128x64xf32>
    %22 = tpu.matmul %20, %21, %cst_22 {dimension_numbers = #tpu.dot_dimension_numbers<[1], [0], [0], [1], [0, 0, 1, 1], [], []>} : vector<128x8xbf16>, vector<8x64xbf16>, vector<128x64xf32> -> vector<128x64xf32>
    %23 = arith.addf %18, %22 : vector<128x64xf32>
    %c0_23 = arith.constant 0 : index
    %c0_24 = arith.constant 0 : index
    %24 = vector.load %arg11[%c0_23, %c0_24] : memref<1x64xf32, #tpu.memory_space<vmem>>, vector<1x64xf32>
    %25 = vector.broadcast %24 : vector<1x64xf32> to vector<128x64xf32>
    %26 = arith.addf %23, %25 : vector<128x64xf32>
    %cst_25 = arith.constant 0.000000e+00 : f32
    %27 = vector.broadcast %cst_25 : f32 to vector<128x64xf32>
    %28 = arith.maximumf %26, %27 : vector<128x64xf32>
    %29 = arith.truncf %28 : vector<128x64xf32> to vector<128x64xbf16>
    %c0_26 = arith.constant 0 : index
    %c0_27 = arith.constant 0 : index
    %30 = vector.load %arg12[%c0_26, %c0_27] : memref<64x32xbf16, #tpu.memory_space<vmem>>, vector<64x32xbf16>
    %cst_28 = arith.constant dense<0.000000e+00> : vector<128x32xf32>
    %31 = tpu.matmul %29, %30, %cst_28 {dimension_numbers = #tpu.dot_dimension_numbers<[1], [0], [0], [1], [0, 0, 1, 1], [], []>} : vector<128x64xbf16>, vector<64x32xbf16>, vector<128x32xf32> -> vector<128x32xf32>
    %c0_29 = arith.constant 0 : index
    %c0_30 = arith.constant 0 : index
    %32 = vector.load %arg13[%c0_29, %c0_30] : memref<1x32xf32, #tpu.memory_space<vmem>>, vector<1x32xf32>
    %33 = vector.broadcast %32 : vector<1x32xf32> to vector<128x32xf32>
    %34 = arith.addf %31, %33 : vector<128x32xf32>
    %cst_31 = arith.constant 0.000000e+00 : f32
    %35 = vector.broadcast %cst_31 : f32 to vector<128x32xf32>
    %36 = arith.maximumf %34, %35 : vector<128x32xf32>
    %37 = arith.truncf %36 : vector<128x32xf32> to vector<128x32xbf16>
    %c0_32 = arith.constant 0 : index
    %c0_33 = arith.constant 0 : index
    %38 = vector.load %arg14[%c0_32, %c0_33] : memref<32x1xbf16, #tpu.memory_space<vmem>>, vector<32x1xbf16>
    %cst_34 = arith.constant dense<0.000000e+00> : vector<128x1xf32>
    %39 = tpu.matmul %37, %38, %cst_34 {dimension_numbers = #tpu.dot_dimension_numbers<[1], [0], [0], [1], [0, 0, 1, 1], [], []>} : vector<128x32xbf16>, vector<32x1xbf16>, vector<128x1xf32> -> vector<128x1xf32>
    %c0_35 = arith.constant 0 : index
    %c0_36 = arith.constant 0 : index
    %40 = vector.load %arg15[%c0_35, %c0_36] : memref<1x1xf32, #tpu.memory_space<vmem>>, vector<1x1xf32>
    %41 = vector.broadcast %40 : vector<1x1xf32> to vector<128x1xf32>
    %42 = arith.addf %39, %41 : vector<128x1xf32>
    %c0_37 = arith.constant 0 : index
    %c0_38 = arith.constant 0 : index
    %43 = vector.load %arg16[%c0_37, %c0_38] : memref<128x1xf32, #tpu.memory_space<vmem>>, vector<128x1xf32>
    tpu.vector_store %arg16[%c0_37, %c0_38], %42 {strides = array<i32>} : memref<128x1xf32, #tpu.memory_space<vmem>>, vector<128x1xf32>,
    return
  }
  func.func @transform_0(%arg0: i32) -> (i32, i32) {
    %c0_i32 = arith.constant 0 : i32
    %c0_i32_0 = arith.constant 0 : i32
    return %arg0, %c0_i32 : i32, i32
  }
  func.func @transform_1(%arg0: i32) -> (i32, i32) {
    %c0_i32 = arith.constant 0 : i32
    %c0_i32_0 = arith.constant 0 : i32
    return %arg0, %c0_i32 : i32, i32
  }
  func.func @transform_2(%arg0: i32) -> (i32, i32) {
    %c0_i32 = arith.constant 0 : i32
    %c0_i32_0 = arith.constant 0 : i32
    return %arg0, %c0_i32 : i32, i32
  }
  func.func @transform_3(%arg0: i32) -> (i32, i32) {
    %c0_i32 = arith.constant 0 : i32
    %c0_i32_0 = arith.constant 0 : i32
    return %arg0, %c0_i32 : i32, i32
  }
  func.func @transform_4(%arg0: i32) -> (i32, i32) {
    %c0_i32 = arith.constant 0 : i32
    %c0_i32_0 = arith.constant 0 : i32
    return %arg0, %c0_i32 : i32, i32
  }
  func.func @transform_5(%arg0: i32) -> (i32, i32) {
    %c0_i32 = arith.constant 0 : i32
    %c0_i32_0 = arith.constant 0 : i32
    %c0_i32_1 = arith.constant 0 : i32
    return %c0_i32, %c0_i32_0 : i32, i32
  }
  func.func @transform_6(%arg0: i32) -> (i32, i32) {
    %c0_i32 = arith.constant 0 : i32
    %c0_i32_0 = arith.constant 0 : i32
    %c0_i32_1 = arith.constant 0 : i32
    return %c0_i32, %c0_i32_0 : i32, i32
  }
  func.func @transform_7(%arg0: i32) -> (i32, i32) {
    %c0_i32 = arith.constant 0 : i32
    %c0_i32_0 = arith.constant 0 : i32
    %c0_i32_1 = arith.constant 0 : i32
    return %c0_i32, %c0_i32_0 : i32, i32
  }
  func.func @transform_8(%arg0: i32) -> (i32, i32) {
    %c0_i32 = arith.constant 0 : i32
    %c0_i32_0 = arith.constant 0 : i32
    %c0_i32_1 = arith.constant 0 : i32
    return %c0_i32, %c0_i32_0 : i32, i32
  }
  func.func @transform_9(%arg0: i32) -> (i32, i32) {
    %c0_i32 = arith.constant 0 : i32
    %c0_i32_0 = arith.constant 0 : i32
    %c0_i32_1 = arith.constant 0 : i32
    return %c0_i32, %c0_i32_0 : i32, i32
  }
  func.func @transform_10(%arg0: i32) -> (i32, i32) {
    %c0_i32 = arith.constant 0 : i32
    %c0_i32_0 = arith.constant 0 : i32
    %c0_i32_1 = arith.constant 0 : i32
    return %c0_i32, %c0_i32_0 : i32, i32
  }
  func.func @transform_11(%arg0: i32) -> (i32, i32) {
    %c0_i32 = arith.constant 0 : i32
    %c0_i32_0 = arith.constant 0 : i32
    %c0_i32_1 = arith.constant 0 : i32
    return %c0_i32, %c0_i32_0 : i32, i32
  }
  func.func @transform_12(%arg0: i32) -> (i32, i32) {
    %c0_i32 = arith.constant 0 : i32
    %c0_i32_0 = arith.constant 0 : i32
    %c0_i32_1 = arith.constant 0 : i32
    return %c0_i32, %c0_i32_0 : i32, i32
  }
  func.func @transform_13(%arg0: i32) -> (i32, i32) {
    %c0_i32 = arith.constant 0 : i32
    %c0_i32_0 = arith.constant 0 : i32
    %c0_i32_1 = arith.constant 0 : i32
    return %c0_i32, %c0_i32_0 : i32, i32
  }
  func.func @transform_14(%arg0: i32) -> (i32, i32) {
    %c0_i32 = arith.constant 0 : i32
    %c0_i32_0 = arith.constant 0 : i32
    %c0_i32_1 = arith.constant 0 : i32
    return %c0_i32, %c0_i32_0 : i32, i32
  }
  func.func @transform_15(%arg0: i32) -> (i32, i32) {
    %c0_i32 = arith.constant 0 : i32
    %c0_i32_0 = arith.constant 0 : i32
    return %arg0, %c0_i32 : i32, i32
  }
}

</mosaic_0001>

<bundles_post_ra>
// kernel: tpu_custom_call.1
= control target key start
LH: loop header
LB: loop body
LE: loop exit
PB: predicated region body
PF: predicated region fallthrough
CT: control target
= control target key end

     0   :  { %s2364_s20 = smov 0   ;;  %s2656_s0 = inlined_call_operand.vmem [shape: f32[256,16], index: 0, kind: input, shape index: {}]   ;;  %s2657_s1 = inlined_call_operand.vmem [shape: f32[256,16], index: 1, kind: input, shape index: {}]   ;;  %s2658_s2 = inlined_call_operand.vmem [shape: f32[256,16], index: 2, kind: input, shape index: {}]   ;;  %s2659_s3 = inlined_call_operand.vmem [shape: f32[256,16], index: 3, kind: input, shape index: {}]   ;;  %s2660_s4 = inlined_call_operand.vmem [shape: f32[256,8], index: 4, kind: input, shape index: {}]   ;;  %s2661_s5 = inlined_call_operand.vmem [shape: bf16[16,64], index: 5, kind: input, shape index: {}]   ;;  %s2662_s6 = inlined_call_operand.vmem [shape: bf16[16,64], index: 6, kind: input, shape index: {}]   ;;  %s2663_s7 = inlined_call_operand.vmem [shape: bf16[16,64], index: 7, kind: input, shape index: {}]   ;;  %s2664_s8 = inlined_call_operand.vmem [shape: bf16[16,64], index: 8, kind: input, shape index: {}]   ;;  %s2665_s9 = inlined_call_operand.vmem [shape: bf16[8,64], index: 9, kind: input, shape index: {}]   ;;  %s2666_s10 = inlined_call_operand.vmem [shape: f32[1,64], index: 10, kind: input, shape index: {}]   ;;  %s2667_s11 = inlined_call_operand.vmem [shape: bf16[64,32], index: 11, kind: input, shape index: {}]   ;;  %s2668_s12 = inlined_call_operand.vmem [shape: f32[1,32], index: 12, kind: input, shape index: {}]   ;;  %s2669_s13 = inlined_call_operand.vmem [shape: bf16[32,1], index: 13, kind: input, shape index: {}]   ;;  %s2670_s14 = inlined_call_operand.<no memory space> [shape: f32[1,1], index: 14, kind: input, shape index: {}]   ;;  %s2671_s15 = inlined_call_operand.vmem [shape: f32[256,1], index: 15, kind: output, shape index: {}]  }
   0x1   :  { %v20_v0 = vstv %s2670_s14 }
   0x2   :  { %21 = vst [vmem:[#allocation2] sm:$0x1] %v20_v0 }
   0x3 LB: > { %s1899_s21 = sadd.s32 4294967295, %s2279_s20   ;;  %p1903_p0 = scmp.ge.s32.totalorder %s2279_s20, 1  ;;  %s2279_s20 = sphi %s2364_s20, %s27_s20  }
   0x4   : > { %p484_p1 = scmp.lt.s32.totalorder %s2279_s20, 3 }
   0x6   : > { %p485_p2 = pnand %p1903_p0, %p484_p1 }
   0x7   : > { %v2263_v1 = vld [vmem:[%s2661_s5] sm:$0xff] (!%p485_p2)   ;;  %s1904_s14 = sshll.u32 (!%p485_p2), %s1899_s21, 4  ;;  %vm647_vm0 = vcmask (!%p485_p2), 130048   ;;  %vm1284_vm1 = vcmask (!%p485_p2), 1043456   ;;  %vm1259_vm2 = vcmask (!%p485_p2), 64512   ;;  %vm1487_vm3 = vcmask (!%p485_p2), 523264  }
   0x8   : > { %488 = sbr.rel (%p485_p2) target bundleno = 790 (0x316), region = 80  ;;  %p553_p3 = scmp.lt.s32.totalorder (!%p485_p2), %s1904_s14, 31  ;;  %2072 = vmatprep.subr.bf16.mxu0 (!%p485_p2), %v2263_v1  ;;  %v2264_v2 = vld [vmem:[%s2663_s7] sm:$0xff] (!%p485_p2)   ;;  %vm1656_vm4 = vcmask (!%p485_p2), 261120   ;;  %vm1778_vm5 = vcmask (!%p485_p2), 7168  }
   0x9   : > { %2073 = vmatpush3.bf16.msra.mxu0 (!%p485_p2), %v2263_v1  ;;  %v2266_v3 = vld [vmem:[%s2662_s6] sm:$0xff] (!%p485_p2)  }
   0xa   : > { %2090 = vmatprep.subr.bf16.mxu0 (!%p485_p2), %v2264_v2  ;;  %2054 = vmatprep.subr.bf16.mxu1 (!%p485_p2), %v2266_v3  ;;  %v2265_v13 = vld [vmem:[%s2664_s8] sm:$0xff] (!%p485_p2)  }
   0xb   : > { %2055 = vmatpush3.bf16.msra.mxu1 (!%p485_p2), %v2266_v3  ;;  %v2439_v41 = vld [vmem:[%s2665_s9] sm:$0xf] (!%p485_p2) }
   0xc   : > { %2188 = vmatprep.subr.bf16.mxu1 (!%p485_p2), %v2263_v1 }
   0xf   : > { %s2673_s14 = smov (!%p553_p3, %s1904_s14), 31 }
  0x10   : > { %s2381_s28 = sshll.u32 %s2673_s14, 3 }
  0x11   : > { %s2387_s16 = scalar_lea.vmem %s2656_s0, %s2381_s28  ;;  %s2403_s22 = scalar_lea.vmem %s2658_s2, %s2381_s28 }
  0x12   : > { %v589_v4 = vld [vmem:[%s2387_s16] sm:$0xff]  ;;  %v590_v5 = vld [vmem:[%s2387_s16 + $0x8] sm:$0xff]  ;;  %v591_v6 = vld [vmem:[%s2387_s16 + $0x10] sm:$0xff]  ;;  %s2413_s24 = scalar_lea.vmem %s2657_s1, %s2381_s28  ;;  %s2471_s30 = scalar_lea.vmem %s2659_s3, %s2381_s28 }
  0x13   : > { %v605_v7 = vpack.c.bf16 %v590_v5, %v589_v4  ;;  %v592_v8 = vld [vmem:[%s2387_s16 + $0x18] sm:$0xff]  ;;  %v593_v9 = vld [vmem:[%s2387_s16 + $0x20] sm:$0xff]  ;;  %v594_v10 = vld [vmem:[%s2387_s16 + $0x28] sm:$0xff]  ;;  %s2514_s18 = scalar_lea.vmem %s2660_s4, %s2381_s28  ;;  %s2619_s14 = scalar_lea.vmem %s2671_s15, %s2381_s28 }
  0x14   : > { %v606_v11 = vpack.c.bf16 %v592_v8, %v591_v6  ;;  %v607_v12 = vpack.c.bf16 %v594_v10, %v593_v9  ;;  %v595_v14 = vld [vmem:[%s2387_s16 + $0x30] sm:$0xff]  ;;  %v596_v15 = vld [vmem:[%s2387_s16 + $0x38] sm:$0xff]  ;;  %v896_v16 = vld [vmem:[%s2403_s22] sm:$0xff] }
  0x15   : > { %2074 = vmatprep.mubr.msk.bf16.mxu0 %vm647_vm0, %v605_v7  ;;  %v897_v17 = vld [vmem:[%s2403_s22 + $0x8] sm:$0xff]  ;;  %v608_v18 = vpack.c.bf16 %v596_v15, %v595_v14  ;;  %v615_v19 = vld [vmem:[%s2413_s24] sm:$0xff]  ;;  %v617_v21 = vld [vmem:[%s2413_s24 + $0x10] sm:$0xff] }
  0x16   : > { %2075 = vmatmul.mubr.msk.bf16.vlgmr.msra.gmra.mrb[0].mxu0 %vm647_vm0, %v606_v11  ;;  %v616_v20 = vld [vmem:[%s2413_s24 + $0x8] sm:$0xff]  ;;  %v912_v22 = vpack.c.bf16 %v897_v17, %v896_v16  ;;  %v618_v24 = vld [vmem:[%s2413_s24 + $0x18] sm:$0xff]  ;;  %v619_v26 = vld [vmem:[%s2413_s24 + $0x20] sm:$0xff] }
  0x17   : > { %2091 = vmatpush3.bf16.msra.mxu0 %v2264_v2  ;;  %2078 = vmatprep.mubr.msk.bf16.mxu0 %vm647_vm0, %v607_v12  ;;  %v631_v23 = vpack.c.bf16 %v616_v20, %v615_v19  ;;  %v632_v25 = vpack.c.bf16 %v618_v24, %v617_v21  ;;  %v620_v27 = vld [vmem:[%s2413_s24 + $0x28] sm:$0xff]  ;;  %v898_v28 = vld [vmem:[%s2403_s22 + $0x10] sm:$0xff]  ;;  %v899_v30 = vld [vmem:[%s2403_s22 + $0x18] sm:$0xff] }
  0x18   : > { %2108 = vmatprep.subr.bf16.mxu0 %v2265_v13  ;;  %v633_v29 = vpack.c.bf16 %v620_v27, %v619_v26  ;;  %v621_v31 = vld [vmem:[%s2413_s24 + $0x30] sm:$0xff]  ;;  %v622_v32 = vld [vmem:[%s2413_s24 + $0x38] sm:$0xff]  ;;  %v900_v33 = vld [vmem:[%s2403_s22 + $0x20] sm:$0xff]  ;;  %v913_v37 = vpack.c.bf16 %v899_v30, %v898_v28 }
  0x19   : > { %2056 = vmatprep.mubr.msk.bf16.mxu1 %vm647_vm0, %v631_v23  ;;  %v901_v34 = vld [vmem:[%s2403_s22 + $0x28] sm:$0xff]  ;;  %v623_v35 = vld [vmem:[%s2413_s24 + $0x40] sm:$0xff]  ;;  %v634_v38 = vpack.c.bf16 %v622_v32, %v621_v31  ;;  %v902_v42 = vld [vmem:[%s2403_s22 + $0x30] sm:$0xff]  ;;  %v1286_v23 = vsel %vm1284_vm1, %v2439_v41, 0 }
  0x1a   : > { %2057 = vmatmul.mubr.msk.bf16.vlgmr.msra.gmra.mrb[0].mxu1 %vm647_vm0, %v632_v25  ;;  %v624_v36 = vld [vmem:[%s2413_s24 + $0x48] sm:$0xff]  ;;  %v914_v39 = vpack.c.bf16 %v901_v34, %v900_v33  ;;  %v903_v43 = vld [vmem:[%s2403_s22 + $0x38] sm:$0xff]  ;;  %v904_v44 = vld [vmem:[%s2403_s22 + $0x40] sm:$0xff] }
  0x1b   : > { %2189 = vmatpush3.bf16.msra.mxu1 %v2263_v1  ;;  %2060 = vmatprep.mubr.msk.bf16.mxu1 %vm647_vm0, %v633_v29  ;;  %v635_v40 = vpack.c.bf16 %v624_v36, %v623_v35  ;;  %v625_v45 = vld [vmem:[%s2413_s24 + $0x50] sm:$0xff]  ;;  %v626_v46 = vld [vmem:[%s2413_s24 + $0x58] sm:$0xff]  ;;  %v905_v47 = vld [vmem:[%s2403_s22 + $0x48] sm:$0xff]  ;;  %v915_v50 = vpack.c.bf16 %v903_v43, %v902_v42 }
  0x1c   : > { %v627_v48 = vld [vmem:[%s2413_s24 + $0x60] sm:$0xff]  ;;  %v628_v49 = vld [vmem:[%s2413_s24 + $0x68] sm:$0xff]  ;;  %v636_v51 = vpack.c.bf16 %v626_v46, %v625_v45  ;;  %v916_v52 = vpack.c.bf16 %v905_v47, %v904_v44  ;;  %v906_v54 = vld [vmem:[%s2403_s22 + $0x50] sm:$0xff] }
  0x1d   : > { %v637_v53 = vpack.c.bf16 %v628_v49, %v627_v48  ;;  %v907_v55 = vld [vmem:[%s2403_s22 + $0x58] sm:$0xff]  ;;  %v908_v56 = vld [vmem:[%s2403_s22 + $0x60] sm:$0xff]  ;;  %v629_v57 = vld [vmem:[%s2413_s24 + $0x70] sm:$0xff] }
  0x1e   : > { %2079 = vmatmul.mubr.msk.bf16.gmra.mrb[4].mxu0 %vm647_vm0, %v608_v18  ;;  %v630_v58 = vld [vmem:[%s2413_s24 + $0x78] sm:$0xff]  ;;  %v909_v59 = vld [vmem:[%s2403_s22 + $0x68] sm:$0xff]  ;;  %v597_v60 = vld [vmem:[%s2387_s16 + $0x40] sm:$0xff]  ;;  %v917_v62 = vpack.c.bf16 %v907_v55, %v906_v54 }
  0x1f   : > { %2092 = vmatprep.mubr.msk.bf16.mxu0 %vm647_vm0, %v912_v22  ;;  %v598_v61 = vld [vmem:[%s2387_s16 + $0x48] sm:$0xff]  ;;  %v638_v63 = vpack.c.bf16 %v630_v58, %v629_v57  ;;  %v918_v0 = vpack.c.bf16 %v909_v59, %v908_v56  ;;  %v910_v2 = vld [vmem:[%s2403_s22 + $0x70] sm:$0xff]  ;;  %v911_v3 = vld [vmem:[%s2403_s22 + $0x78] sm:$0xff] }
  0x20   : > { %v609_v1 = vpack.c.bf16 %v598_v61, %v597_v60  ;;  %v1065_v4 = vld [vmem:[%s2471_s30] sm:$0xff]  ;;  %v599_v5 = vld [vmem:[%s2387_s16 + $0x50] sm:$0xff]  ;;  %v600_v6 = vld [vmem:[%s2387_s16 + $0x58] sm:$0xff]  ;;  %v919_v10 = vpack.c.bf16 %v911_v3, %v910_v2 }
  0x21   : > { %v1066_v7 = vld [vmem:[%s2471_s30 + $0x8] sm:$0xff]  ;;  %v601_v8 = vld [vmem:[%s2387_s16 + $0x60] sm:$0xff]  ;;  %v610_v11 = vpack.c.bf16 %v600_v6, %v599_v5  ;;  %v1067_v14 = vld [vmem:[%s2471_s30 + $0x10] sm:$0xff] }
  0x22   : > { %2061 = vmatmul.mubr.msk.bf16.gmra.mrb[4].mxu1 %vm647_vm0, %v634_v38  ;;  %v602_v9 = vld [vmem:[%s2387_s16 + $0x68] sm:$0xff]  ;;  %v1081_v12 = vpack.c.bf16 %v1066_v7, %v1065_v4  ;;  %v1068_v15 = vld [vmem:[%s2471_s30 + $0x18] sm:$0xff]  ;;  %v603_v16 = vld [vmem:[%s2387_s16 + $0x70] sm:$0xff] }
  0x23   : > { %2064 = vmatprep.mubr.msk.bf16.mxu1 %vm647_vm0, %v635_v40  ;;  %v604_v17 = vld [vmem:[%s2387_s16 + $0x78] sm:$0xff]  ;;  %v1069_v18 = vld [vmem:[%s2471_s30 + $0x20] sm:$0xff]  ;;  %v1070_v19 = vld [vmem:[%s2471_s30 + $0x28] sm:$0xff]  ;;  %v1082_v20 = vpack.c.bf16 %v1068_v15, %v1067_v14 }
  0x24   : > { %v612_v21 = vpack.c.bf16 %v604_v17, %v603_v16  ;;  %v1083_v22 = vpack.c.bf16 %v1070_v19, %v1069_v18  ;;  %v1071_v24 = vld [vmem:[%s2471_s30 + $0x30] sm:$0xff]  ;;  %v1072_v25 = vld [vmem:[%s2471_s30 + $0x38] sm:$0xff]  ;;  %v1073_v26 = vld [vmem:[%s2471_s30 + $0x40] sm:$0xff] }
  0x25   : > { %v1074_v27 = vld [vmem:[%s2471_s30 + $0x48] sm:$0xff]  ;;  %v1084_v28 = vpack.c.bf16 %v1072_v25, %v1071_v24  ;;  %v1075_v30 = vld [vmem:[%s2471_s30 + $0x50] sm:$0xff]  ;;  %v1076_v31 = vld [vmem:[%s2471_s30 + $0x58] sm:$0xff] }
  0x26   : > { %2093 = vmatmul.mubr.msk.bf16.vlgmr.msra.gmra.mrb[0].mxu0 %vm647_vm0, %v913_v37  ;;  %v1085_v29 = vpack.c.bf16 %v1074_v27, %v1073_v26  ;;  %v1077_v32 = vld [vmem:[%s2471_s30 + $0x60] sm:$0xff]  ;;  %v1078_v33 = vld [vmem:[%s2471_s30 + $0x68] sm:$0xff]  ;;  %v1086_v34 = vpack.c.bf16 %v1076_v31, %v1075_v30  ;;  %v1079_v36 = vld [vmem:[%s2471_s30 + $0x70] sm:$0xff] }
  0x27   : > { %2109 = vmatpush3.bf16.msra.mxu0 %v2265_v13  ;;  %2096 = vmatprep.mubr.msk.bf16.mxu0 %vm647_vm0, %v914_v39  ;;  %v611_v13 = vpack.c.bf16 %v602_v9, %v601_v8  ;;  %v1087_v35 = vpack.c.bf16 %v1078_v33, %v1077_v32  ;;  %v1080_v37 = vld [vmem:[%s2471_s30 + $0x78] sm:$0xff]  ;;  %v1234_v38 = vld [vmem:[%s2514_s18] sm:$0xff]  ;;  %v1235_v39 = vld [vmem:[%s2514_s18 + $0x8] sm:$0xff] }
  0x28   : > { %2254 = vmatprep.subr.msk.bf16.mxu0 %vm1284_vm1, %v2439_v41  ;;  %v1088_v40 = vpack.c.bf16 %v1080_v37, %v1079_v36  ;;  %v1250_v41 = vpack.c.bf16 %v1235_v39, %v1234_v38  ;;  %v1236_v42 = vld [vmem:[%s2514_s18 + $0x10] sm:$0xff]  ;;  %v1237_v43 = vld [vmem:[%s2514_s18 + $0x18] sm:$0xff]  ;;  %v1238_v44 = vld [vmem:[%s2514_s18 + $0x20] sm:$0xff] }
  0x29   : > { %v1239_v45 = vld [vmem:[%s2514_s18 + $0x28] sm:$0xff]  ;;  %v1251_v46 = vpack.c.bf16 %v1237_v43, %v1236_v42  ;;  %v1240_v48 = vld [vmem:[%s2514_s18 + $0x30] sm:$0xff]  ;;  %v1241_v49 = vld [vmem:[%s2514_s18 + $0x38] sm:$0xff] }
  0x2a   : > { %2065 = vmatmul.mubr.msk.bf16.gmra.mrb[8].mxu1 %vm647_vm0, %v636_v51  ;;  %v1252_v47 = vpack.c.bf16 %v1239_v45, %v1238_v44  ;;  %v1243_v51 = vld [vmem:[%s2514_s18 + $0x48] sm:$0xff]  ;;  %v1244_v54 = vld [vmem:[%s2514_s18 + $0x50] sm:$0xff]  ;;  %v1245_v55 = vld [vmem:[%s2514_s18 + $0x58] sm:$0xff] }
  0x2b   : > { %2068 = vmatprep.mubr.msk.bf16.mxu1 %vm647_vm0, %v637_v53  ;;  %v1246_v56 = vld [vmem:[%s2514_s18 + $0x60] sm:$0xff]  ;;  %v1247_v57 = vld [vmem:[%s2514_s18 + $0x68] sm:$0xff]  ;;  %v1255_v58 = vpack.c.bf16 %v1245_v55, %v1244_v54  ;;  %v1248_v60 = vld [vmem:[%s2514_s18 + $0x70] sm:$0xff] }
  0x2c   : > { %v1256_v59 = vpack.c.bf16 %v1247_v57, %v1246_v56  ;;  %v1249_v61 = vld [vmem:[%s2514_s18 + $0x78] sm:$0xff]  ;;  %v2271_v3 = vld [vmem:[%s2669_s13] sm:$0xff]  }
  0x2d   : > { %v2270_v2 = vld [vmem:[%s2667_s11 + $0x18] sm:$0xff]  }
  0x2e   : > { %2097 = vmatmul.mubr.msk.bf16.gmra.mrb[4].mxu0 %vm647_vm0, %v915_v50  ;;  %v1242_v50 = vld [vmem:[%s2514_s18 + $0x40] sm:$0xff] }
  0x2f   : > { %2100 = vmatprep.mubr.msk.bf16.mxu0 %vm647_vm0, %v916_v52  ;;  %v1253_v52 = vpack.c.bf16 %v1241_v49, %v1240_v48  ;;  %v1254_v53 = vpack.c.bf16 %v1243_v51, %v1242_v50 }
  0x32   : > { %2069 = vmatmul.mubr.msk.bf16.gmra.mrb[12].mxu1 %vm647_vm0, %v638_v63  ;;  %v2267_v63 = vld [vmem:[%s2667_s11] sm:$0xff]  }
  0x33   : > { %2082 = vmatprep.mubr.msk.bf16.mxu1 %vm647_vm0, %v609_v1  ;;  %2144 = vmatprep.subr.bf16.mxu1 %v2267_v63  ;;  %v2269_v1 = vld [vmem:[%s2667_s11 + $0x10] sm:$0xff]  }
  0x36   : > { %2101 = vmatmul.mubr.msk.bf16.gmra.mrb[8].mxu0 %vm647_vm0, %v917_v62  ;;  %v1257_v62 = vpack.c.bf16 %v1249_v61, %v1248_v60 }
  0x37   : > { %2104 = vmatprep.mubr.msk.bf16.mxu0 %vm647_vm0, %v918_v0  ;;  %v2268_v0 = vld [vmem:[%s2667_s11 + $0x8] sm:$0xff]  }
  0x3a   : > { %2083 = vmatmul.mubr.msk.bf16.vlgmr.msra.gmra.mrb[8].mxu1 %vm647_vm0, %v610_v11 }
  0x3b   : > { %2086 = vmatprep.mubr.msk.bf16.mxu1 %vm647_vm0, %v611_v13  ;;  %2145 = vmatpush3.bf16.msra.mxu1 %v2267_v63 }
  0x3c   : > { %2146 = vmatprep.subr.bf16.mxu1 %v2268_v0 }
  0x3e   : > { %2105 = vmatmul.mubr.msk.bf16.gmra.mrb[12].mxu0 %vm647_vm0, %v919_v10 }
  0x3f   : > { %2110 = vmatprep.mubr.msk.bf16.mxu0 %vm647_vm0, %v1081_v12  ;;  %2147 = vmatpush3.bf16.msra.mxu1 %v2268_v0 }
  0x40   : > { %2148 = vmatprep.subr.bf16.mxu1 %v2269_v1 }
  0x42   : > { %2087 = vmatmul.mubr.msk.bf16.gmra.mrb[12].mxu1 %vm647_vm0, %v612_v21  ;;  %v2571_v21 = vld [vmem:[%s2666_s10] ss:$0 sm:$0xff] }
  0x43   : > { %2149 = vmatpush3.bf16.msra.mxu1 %v2269_v1 }
  0x44   : > { %2150 = vmatprep.subr.bf16.mxu1 %v2270_v2 }
  0x46   : > { %2111 = vmatmul.mubr.msk.bf16.vlgmr.msra.gmra.mrb[0].mxu0 %vm647_vm0, %v1082_v20 }
  0x47   : > { %2127 = vmatpush3.bf16.msra.mxu0 %v1286_v23  ;;  %2114 = vmatprep.mubr.msk.bf16.mxu0 %vm647_vm0, %v1083_v22 }
  0x48   : > { %2151 = vmatpush3.bf16.msra.mxu1 %v2270_v2 }
  0x49   : > { %2168 = vmatprep.subr.bf16.mxu1 %v2271_v3 }
  0x4e   : > { %2115 = vmatmul.mubr.msk.bf16.gmra.mrb[4].mxu0 %vm647_vm0, %v1084_v28 }
  0x4f   : > { %2118 = vmatprep.mubr.msk.bf16.mxu0 %vm647_vm0, %v1085_v29 }
  0x56   : > { %2119 = vmatmul.mubr.msk.bf16.gmra.mrb[8].mxu0 %vm647_vm0, %v1086_v34 }
  0x57   : > { %2122 = vmatprep.mubr.msk.bf16.mxu0 %vm647_vm0, %v1087_v35 }
  0x5e   : > { %2123 = vmatmul.mubr.msk.bf16.gmra.mrb[12].mxu0 %vm647_vm0, %v1088_v40 }
  0x5f   : > { %2128 = vmatprep.mubr.msk.bf16.mxu0 %vm1259_vm2, %v1250_v41 }
  0x66   : > { %2129 = vmatmul.mubr.msk.bf16.vlgmr.msra.gmra.mrb[0].mxu0 %vm1259_vm2, %v1251_v46 }
  0x67   : > { %2132 = vmatprep.mubr.msk.bf16.mxu0 %vm1259_vm2, %v1252_v47  ;;  %v2272_v47 = vld [vmem:[%s2669_s13 + $0x8] sm:$0xff]  }
  0x6e   : > { %2133 = vmatmul.mubr.msk.bf16.gmra.mrb[4].mxu0 %vm1259_vm2, %v1253_v52 }
  0x6f   : > { %2136 = vmatprep.mubr.msk.bf16.mxu0 %vm1259_vm2, %v1254_v53 }
  0x76   : > { %2137 = vmatmul.mubr.msk.bf16.gmra.mrb[8].mxu0 %vm1259_vm2, %v1255_v58 }
  0x77   : > { %2140 = vmatprep.mubr.msk.bf16.mxu0 %vm1259_vm2, %v1256_v59 }
  0x7e   : > { %2141 = vmatmul.mubr.msk.bf16.gmra.mrb[12].mxu0 %vm1259_vm2, %v1257_v62 }
  0xed   : > { %v2058_v4 = vpop.f32.mrb[0].mxu1 }
  0xee   : > { %v706_v5 = vpop.f32.mrb[1].mxu1 }
  0xef   : > { %v2059_v6 = vpop.f32.mrb[2].mxu1 }
  0xf0   : > { %v709_v7 = vpop.f32.mrb[3].mxu1 }
  0xf5   : > { %v2062_v8 = vpop.f32.mrb[4].mxu1 }
  0xf6   : > { %v722_v9 = vpop.f32.mrb[5].mxu1 }
  0xf7   : > { %v2063_v10 = vpop.f32.mrb[6].mxu1 }
  0xf8   : > { %v725_v11 = vpop.f32.mrb[7].mxu1 }
 0x10d   : > { %v2084_v12 = vpop.f32.mrb[8].mxu1 }
 0x10e   : > { %v865_v13 = vpop.f32.mrb[9].mxu1 }
 0x10f   : > { %v2085_v14 = vpop.f32.mrb[10].mxu1 }
 0x110   : > { %v868_v15 = vpop.f32.mrb[11].mxu1 }
 0x115   : > { %v2560_v16 = vpop.f32.mrb[12].mxu1 }
 0x116   : > { %v2562_v17 = vpop.f32.mrb[13].mxu1 }
 0x117   : > { %v2564_v18 = vpop.f32.mrb[14].mxu1 }
 0x118   : > { %v2566_v19 = vpop.f32.mrb[15].mxu1 }
 0x139   : > { %v2130_v20 = vpop.f32.mrb[0].mxu0 }
 0x13a   : > { %v2190_v22 = vadd.f32 %v2130_v20, %v2058_v4  ;;  %v1322_v23 = vpop.f32.mrb[1].mxu0 }
 0x13b   : > { %v2191_v24 = vadd.f32 %v1322_v23, %v706_v5  ;;  %v2131_v25 = vpop.f32.mrb[2].mxu0 }
 0x13c   : > { %v1410_v26 = vadd.f32 %v2190_v22, %v2571_v21  ;;  %v2192_v27 = vadd.f32 %v2131_v25, %v2059_v6  ;;  %v1325_v28 = vpop.f32.mrb[3].mxu0 }
 0x13d   : > { %v1408_v29 = vadd.f32 %v2191_v24, %v2571_v21  ;;  %v2193_v30 = vadd.f32 %v1325_v28, %v709_v7 }
 0x13e   : > { %v1411_v31 = vadd.f32 %v2192_v27, %v2571_v21  ;;  %v1426_v33 = vmax.f32 %v1410_v26, 0.0 }
 0x13f   : > { %v1409_v32 = vadd.f32 %v2193_v30, %v2571_v21  ;;  %v1424_v35 = vmax.f32 %v1408_v29, 0.0 }
 0x140   : > { %v1427_v34 = vmax.f32 %v1411_v31, 0.0 }
 0x141   : > { %v1425_v36 = vmax.f32 %v1409_v32, 0.0  ;;  %v2134_v37 = vpop.f32.mrb[4].mxu0 }
 0x142   : > { %v1441_v38 = vpack.c.bf16 %v1427_v34, %v1426_v33  ;;  %v2194_v39 = vadd.f32 %v2134_v37, %v2062_v8  ;;  %v1338_v40 = vpop.f32.mrb[5].mxu0 }
 0x143   : > { %v1440_v41 = vpack.c.bf16 %v1425_v36, %v1424_v35  ;;  %v2195_v42 = vadd.f32 %v1338_v40, %v722_v9  ;;  %v2135_v43 = vpop.f32.mrb[6].mxu0 }
 0x144   : > { %v1414_v44 = vadd.f32 %v2194_v39, %v2571_v21  ;;  %v2196_v45 = vadd.f32 %v2135_v43, %v2063_v10  ;;  %v1341_v46 = vpop.f32.mrb[7].mxu0 }
 0x145   : > { %v1412_v48 = vadd.f32 %v2195_v42, %v2571_v21  ;;  %v2197_v49 = vadd.f32 %v1341_v46, %v725_v11  ;;  %2152 = vmatprep.mubr.msk.bf16.mxu1 %vm1487_vm3, %v1440_v41 }
 0x146   : > { %v1415_v50 = vadd.f32 %v2196_v45, %v2571_v21  ;;  %2153 = vmatmul.mubr.msk.bf16.vlgmr.msra.gmra.mrb[16].mxu1 %vm1487_vm3, %v1441_v38  ;;  %v1430_v52 = vmax.f32 %v1414_v44, 0.0 }
 0x147   : > { %v1413_v51 = vadd.f32 %v2197_v49, %v2571_v21  ;;  %2169 = vmatpush3.bf16.msra.mxu1 %v2271_v3  ;;  %v1428_v54 = vmax.f32 %v1412_v48, 0.0 }
 0x148   : > { %v1431_v53 = vmax.f32 %v1415_v50, 0.0  ;;  %2170 = vmatprep.subr.bf16.mxu1 %v2272_v47 }
 0x149   : > { %v1429_v55 = vmax.f32 %v1413_v51, 0.0  ;;  %v2138_v56 = vpop.f32.mrb[8].mxu0 }
 0x14a   : > { %v1443_v57 = vpack.c.bf16 %v1431_v53, %v1430_v52  ;;  %v2198_v58 = vadd.f32 %v2138_v56, %v2084_v12  ;;  %v1354_v59 = vpop.f32.mrb[9].mxu0 }
 0x14b   : > { %v1442_v60 = vpack.c.bf16 %v1429_v55, %v1428_v54  ;;  %v2199_v61 = vadd.f32 %v1354_v59, %v865_v13  ;;  %v2139_v62 = vpop.f32.mrb[10].mxu0  ;;  %2171 = vmatpush3.bf16.msra.mxu1 %v2272_v47 }
 0x14c   : > { %v1418_v63 = vadd.f32 %v2198_v58, %v2571_v21  ;;  %v2200_v0 = vadd.f32 %v2139_v62, %v2085_v14  ;;  %v1357_v1 = vpop.f32.mrb[11].mxu0 }
 0x14d   : > { %v1416_v2 = vadd.f32 %v2199_v61, %v2571_v21  ;;  %v2201_v3 = vadd.f32 %v1357_v1, %v868_v15  ;;  %2156 = vmatprep.mubr.msk.bf16.mxu1 %vm1487_vm3, %v1442_v60 }
 0x14e   : > { %v1419_v4 = vadd.f32 %v2200_v0, %v2571_v21  ;;  %2157 = vmatmul.mubr.msk.bf16.gmra.mrb[20].mxu1 %vm1487_vm3, %v1443_v57  ;;  %v1434_v6 = vmax.f32 %v1418_v63, 0.0 }
 0x14f   : > { %v1417_v5 = vadd.f32 %v2201_v3, %v2571_v21  ;;  %v1432_v8 = vmax.f32 %v1416_v2, 0.0 }
 0x150   : > { %v1435_v7 = vmax.f32 %v1419_v4, 0.0 }
 0x151   : > { %v1433_v9 = vmax.f32 %v1417_v5, 0.0  ;;  %v2142_v10 = vpop.f32.mrb[12].mxu0 }
 0x152   : > { %v1445_v11 = vpack.c.bf16 %v1435_v7, %v1434_v6  ;;  %v2202_v12 = vadd.f32 %v2142_v10, %v2560_v16  ;;  %v1370_v13 = vpop.f32.mrb[13].mxu0 }
 0x153   : > { %v1444_v14 = vpack.c.bf16 %v1433_v9, %v1432_v8  ;;  %v2203_v15 = vadd.f32 %v1370_v13, %v2562_v17  ;;  %v2143_v20 = vpop.f32.mrb[14].mxu0 }
 0x154   : > { %v1422_v22 = vadd.f32 %v2202_v12, %v2571_v21  ;;  %v2204_v23 = vadd.f32 %v2143_v20, %v2564_v18  ;;  %v1373_v24 = vpop.f32.mrb[15].mxu0  ;;  %v1961_v18 = vld [vmem:[%s2668_s12] ss:$0 sm:$0xff] }
 0x155   : > { %v1420_v25 = vadd.f32 %v2203_v15, %v2571_v21  ;;  %v2205_v26 = vadd.f32 %v1373_v24, %v2566_v19  ;;  %2160 = vmatprep.mubr.msk.bf16.mxu1 %vm1487_vm3, %v1444_v14 }
 0x156   : > { %v1423_v27 = vadd.f32 %v2204_v23, %v2571_v21  ;;  %2161 = vmatmul.mubr.msk.bf16.gmra.mrb[24].mxu1 %vm1487_vm3, %v1445_v11  ;;  %v1438_v28 = vmax.f32 %v1422_v22, 0.0 }
 0x157   : > { %v1421_v16 = vadd.f32 %v2205_v26, %v2571_v21  ;;  %v1436_v29 = vmax.f32 %v1420_v25, 0.0 }
 0x158   : > { %v1439_v17 = vmax.f32 %v1423_v27, 0.0 }
 0x159   : > { %v1437_v30 = vmax.f32 %v1421_v16, 0.0  ;;  %v1974_v16 = vld [vmem:[#allocation2] ss:$0 sm:$0xff] }
 0x15a   : > { %v1447_v31 = vpack.c.bf16 %v1439_v17, %v1438_v28 }
 0x15b   : > { %v1446_v32 = vpack.c.bf16 %v1437_v30, %v1436_v29 }
 0x15d   : > { %2164 = vmatprep.mubr.msk.bf16.mxu1 %vm1487_vm3, %v1446_v32 }
 0x15e   : > { %2165 = vmatmul.mubr.msk.bf16.gmra.mrb[28].mxu1 %vm1487_vm3, %v1447_v31 }
 0x219   : > { %v2154_v19 = vpop.f32.mrb[16].mxu1 }
 0x21a   : > { %v1555_v33 = vadd.f32 %v2154_v19, %v1961_v18  ;;  %v1546_v34 = vpop.f32.mrb[17].mxu1 }
 0x21b   : > { %v1547_v35 = vadd.f32 %v1961_v18, %v1546_v34  ;;  %v2155_v36 = vpop.f32.mrb[18].mxu1 }
 0x21c   : > { %v1558_v21 = vadd.f32 %v2155_v36, %v1961_v18  ;;  %v1549_v37 = vpop.f32.mrb[19].mxu1  ;;  %v1611_v39 = vmax.f32 %v1555_v33, 0.0 }
 0x21d   : > { %v1550_v38 = vadd.f32 %v1961_v18, %v1549_v37  ;;  %v1609_v41 = vmax.f32 %v1547_v35, 0.0 }
 0x21e   : > { %v1612_v40 = vmax.f32 %v1558_v21, 0.0 }
 0x21f   : > { %v1610_v42 = vmax.f32 %v1550_v38, 0.0 }
 0x220   : > { %v1626_v43 = vpack.c.bf16 %v1612_v40, %v1611_v39 }
 0x221   : > { %v1625_v44 = vpack.c.bf16 %v1610_v42, %v1609_v41  ;;  %v2158_v45 = vpop.f32.mrb[20].mxu1 }
 0x222   : > { %v1571_v46 = vadd.f32 %v2158_v45, %v1961_v18  ;;  %v1562_v47 = vpop.f32.mrb[21].mxu1 }
 0x223   : > { %v1563_v48 = vadd.f32 %v1961_v18, %v1562_v47  ;;  %v2159_v49 = vpop.f32.mrb[22].mxu1  ;;  %2172 = vmatprep.mubr.msk.bf16.mxu1 %vm1656_vm4, %v1625_v44 }
 0x224   : > { %v1574_v50 = vadd.f32 %v2159_v49, %v1961_v18  ;;  %v1565_v51 = vpop.f32.mrb[23].mxu1  ;;  %2173 = vmatmul.mubr.msk.bf16.vlgmr.msra.gmra.mrb[32].mxu1 %vm1656_vm4, %v1626_v43  ;;  %v1615_v53 = vmax.f32 %v1571_v46, 0.0 }
 0x225   : > { %v1566_v52 = vadd.f32 %v1961_v18, %v1565_v51  ;;  %v1613_v55 = vmax.f32 %v1563_v48, 0.0 }
 0x226   : > { %v1616_v54 = vmax.f32 %v1574_v50, 0.0 }
 0x227   : > { %v1614_v56 = vmax.f32 %v1566_v52, 0.0 }
 0x228   : > { %v1628_v57 = vpack.c.bf16 %v1616_v54, %v1615_v53 }
 0x229   : > { %v1627_v58 = vpack.c.bf16 %v1614_v56, %v1613_v55  ;;  %v2162_v59 = vpop.f32.mrb[24].mxu1 }
 0x22a   : > { %v1587_v60 = vadd.f32 %v2162_v59, %v1961_v18  ;;  %v1578_v61 = vpop.f32.mrb[25].mxu1 }
 0x22b   : > { %v1579_v62 = vadd.f32 %v1961_v18, %v1578_v61  ;;  %v2163_v63 = vpop.f32.mrb[26].mxu1  ;;  %2176 = vmatprep.mubr.msk.bf16.mxu1 %vm1656_vm4, %v1627_v58 }
 0x22c   : > { %v1590_v0 = vadd.f32 %v2163_v63, %v1961_v18  ;;  %v1581_v1 = vpop.f32.mrb[27].mxu1  ;;  %2177 = vmatmul.mubr.msk.bf16.gmra.mrb[36].mxu1 %vm1656_vm4, %v1628_v57  ;;  %v1619_v3 = vmax.f32 %v1587_v60, 0.0 }
 0x22d   : > { %v1582_v2 = vadd.f32 %v1961_v18, %v1581_v1  ;;  %v1617_v5 = vmax.f32 %v1579_v62, 0.0 }
 0x22e   : > { %v1620_v4 = vmax.f32 %v1590_v0, 0.0 }
 0x22f   : > { %v1618_v6 = vmax.f32 %v1582_v2, 0.0 }
 0x230   : > { %v1630_v7 = vpack.c.bf16 %v1620_v4, %v1619_v3 }
 0x231   : > { %v1629_v8 = vpack.c.bf16 %v1618_v6, %v1617_v5  ;;  %v2166_v9 = vpop.f32.mrb[28].mxu1 }
 0x232   : > { %v1603_v10 = vadd.f32 %v2166_v9, %v1961_v18  ;;  %v1594_v11 = vpop.f32.mrb[29].mxu1 }
 0x233   : > { %v1595_v12 = vadd.f32 %v1961_v18, %v1594_v11  ;;  %v2167_v13 = vpop.f32.mrb[30].mxu1  ;;  %2180 = vmatprep.mubr.msk.bf16.mxu1 %vm1656_vm4, %v1629_v8 }
 0x234   : > { %v1606_v14 = vadd.f32 %v2167_v13, %v1961_v18  ;;  %v1597_v15 = vpop.f32.mrb[31].mxu1  ;;  %2181 = vmatmul.mubr.msk.bf16.gmra.mrb[40].mxu1 %vm1656_vm4, %v1630_v7  ;;  %v1623_v22 = vmax.f32 %v1603_v10, 0.0 }
 0x235   : > { %v1598_v20 = vadd.f32 %v1961_v18, %v1597_v15  ;;  %v1621_v24 = vmax.f32 %v1595_v12, 0.0 }
 0x236   : > { %v1624_v23 = vmax.f32 %v1606_v14, 0.0 }
 0x237   : > { %v1622_v25 = vmax.f32 %v1598_v20, 0.0 }
 0x238   : > { %v1632_v26 = vpack.c.bf16 %v1624_v23, %v1623_v22 }
 0x239   : > { %v1631_v27 = vpack.c.bf16 %v1622_v25, %v1621_v24 }
 0x23b   : > { %2184 = vmatprep.mubr.msk.bf16.mxu1 %vm1656_vm4, %v1631_v27 }
 0x23c   : > { %2185 = vmatmul.mubr.msk.bf16.gmra.mrb[44].mxu1 %vm1656_vm4, %v1632_v26 }
 0x2f7   : > { %v2174_v28 = vpop.f32.mrb[32].mxu1 }
 0x2f8   : > { %v1724_v17 = vadd.f32 %v2174_v28, %v1974_v16  ;;  %v1715_v29 = vpop.f32.mrb[33].mxu1 }
 0x2f9   : > { %v1716_v30 = vadd.f32 %v1974_v16, %v1715_v29  ;;  %v2175_v31 = vpop.f32.mrb[34].mxu1 }
 0x2fa   : > { %1781 = vst.msk [vmem:[%s2619_s14 + $0x10] sm:$0xff] %vm1778_vm5, %v1724_v17  ;;  %v1727_v32 = vadd.f32 %v2175_v31, %v1974_v16  ;;  %v1718_v18 = vpop.f32.mrb[35].mxu1 }
 0x2fb   : > { %1779 = vst.msk [vmem:[%s2619_s14] sm:$0xff] %vm1778_vm5, %v1716_v30  ;;  %v1719_v19 = vadd.f32 %v1974_v16, %v1718_v18 }
 0x2fc   : > { %1782 = vst.msk [vmem:[%s2619_s14 + $0x18] sm:$0xff] %vm1778_vm5, %v1727_v32 }
 0x2fd   : > { %1780 = vst.msk [vmem:[%s2619_s14 + $0x8] sm:$0xff] %vm1778_vm5, %v1719_v19 }
 0x2ff   : > { %v2178_v33 = vpop.f32.mrb[36].mxu1 }
 0x300   : > { %v1740_v34 = vadd.f32 %v2178_v33, %v1974_v16  ;;  %v1731_v35 = vpop.f32.mrb[37].mxu1 }
 0x301   : > { %v1732_v36 = vadd.f32 %v1974_v16, %v1731_v35  ;;  %v2179_v21 = vpop.f32.mrb[38].mxu1 }
 0x302   : > { %1785 = vst.msk [vmem:[%s2619_s14 + $0x30] sm:$0xff] %vm1778_vm5, %v1740_v34  ;;  %v1743_v37 = vadd.f32 %v2179_v21, %v1974_v16  ;;  %v1734_v38 = vpop.f32.mrb[39].mxu1 }
 0x303   : > { %1783 = vst.msk [vmem:[%s2619_s14 + $0x20] sm:$0xff] %vm1778_vm5, %v1732_v36  ;;  %v1735_v39 = vadd.f32 %v1974_v16, %v1734_v38 }
 0x304   : > { %1786 = vst.msk [vmem:[%s2619_s14 + $0x38] sm:$0xff] %vm1778_vm5, %v1743_v37 }
 0x305   : > { %1784 = vst.msk [vmem:[%s2619_s14 + $0x28] sm:$0xff] %vm1778_vm5, %v1735_v39 }
 0x307   : > { %v2182_v40 = vpop.f32.mrb[40].mxu1 }
 0x308   : > { %v1756_v41 = vadd.f32 %v2182_v40, %v1974_v16  ;;  %v1747_v42 = vpop.f32.mrb[41].mxu1 }
 0x309   : > { %v1748_v43 = vadd.f32 %v1974_v16, %v1747_v42  ;;  %v2183_v44 = vpop.f32.mrb[42].mxu1 }
 0x30a   : > { %1789 = vst.msk [vmem:[%s2619_s14 + $0x50] sm:$0xff] %vm1778_vm5, %v1756_v41  ;;  %v1759_v45 = vadd.f32 %v2183_v44, %v1974_v16  ;;  %v1750_v46 = vpop.f32.mrb[43].mxu1 }
 0x30b   : > { %1787 = vst.msk [vmem:[%s2619_s14 + $0x40] sm:$0xff] %vm1778_vm5, %v1748_v43  ;;  %v1751_v47 = vadd.f32 %v1974_v16, %v1750_v46 }
 0x30c   : > { %1790 = vst.msk [vmem:[%s2619_s14 + $0x58] sm:$0xff] %vm1778_vm5, %v1759_v45 }
 0x30d   : > { %1788 = vst.msk [vmem:[%s2619_s14 + $0x48] sm:$0xff] %vm1778_vm5, %v1751_v47 }
 0x30f   : > { %v2186_v48 = vpop.f32.mrb[44].mxu1 }
 0x310   : > { %v1772_v49 = vadd.f32 %v2186_v48, %v1974_v16  ;;  %v1763_v50 = vpop.f32.mrb[45].mxu1 }
 0x311   : > { %v1764_v51 = vadd.f32 %v1974_v16, %v1763_v50  ;;  %v2187_v52 = vpop.f32.mrb[46].mxu1 }
 0x312   : > { %1793 = vst.msk [vmem:[%s2619_s14 + $0x70] sm:$0xff] %vm1778_vm5, %v1772_v49  ;;  %v1775_v53 = vadd.f32 %v2187_v52, %v1974_v16  ;;  %v1766_v54 = vpop.f32.mrb[47].mxu1 }
 0x313   : > { %1791 = vst.msk [vmem:[%s2619_s14 + $0x60] sm:$0xff] %vm1778_vm5, %v1764_v51  ;;  %v1767_v55 = vadd.f32 %v1974_v16, %v1766_v54 }
 0x314   : > { %1794 = vst.msk [vmem:[%s2619_s14 + $0x78] sm:$0xff] %vm1778_vm5, %v1775_v53 }
 0x315   : > { %1792 = vst.msk [vmem:[%s2619_s14 + $0x68] sm:$0xff] %vm1778_vm5, %v1767_v55 }
 0x316 PF: > { %s27_s20 = sadd.s32 1, %s2279_s20  }
 0x317   : > { %p24_p4 = scmp.ge.s32.totalorder %s27_s20, 4  }
 0x319   :  { %26 = sbr.rel (!%p24_p4) target bundleno = 3 (0x3), region = 122 }

</bundles_post_ra>
